<compile_context>
chip_gen: v7x
topology: tpu7x:2x2x1
jax: 0.10.0
libtpu: 0.0.40
codegen_flags: <defaults>
</compile_context>

<pallas_src>
import functools
import math

import jax
import jax.numpy as jnp
from jax.experimental import pallas as pl
from jax.experimental.pallas import tpu as pltpu


def _mlp_share_kernel(x_ref, w1_ref, b1_ref, w2_ref, b2_ref, o_ref):
    # fc1: [TB, D] @ [D, H] with f32 accumulation. Cast X on-chip to the
    # weight dtype (bf16 path) so the wrapper never writes a casted X to HBM.
    x = x_ref[...].astype(w1_ref.dtype)
    h = jnp.dot(x, w1_ref[...], preferred_element_type=jnp.float32)
    # bias + ReLU in f32
    h = jnp.maximum(h + b1_ref[...], 0.0)
    # fc2: [TB, H] @ [H, C]
    h = h.astype(w2_ref.dtype)
    out = jnp.dot(h, w2_ref[...], preferred_element_type=jnp.float32)
    o_ref[...] = (out + b2_ref[...]).astype(o_ref.dtype)


def _round_up(x, m):
    return (x + m - 1) // m * m


def _num_tensorcores():
    """Best-effort TensorCore count (2 on v7x). Safe fallback: 1 (v5e/v6e)."""
    try:
        info = pltpu.get_tpu_info()
        for attr in ("num_cores", "core_count", "num_tensorcores", "tensorcore_count"):
            v = getattr(info, attr, None)
            if isinstance(v, int) and v >= 1:
                return v
    except Exception:
        pass
    return 1


@functools.partial(jax.jit, static_argnames=("block_b", "use_bf16", "num_cores"))
def base_mlp_share_forward(x, w1_t, b1, w2_t, b2, *, block_b=2048,
                           use_bf16=False, num_cores=1):
    """Fused fc1 -> relu -> fc2 (fc1/fc2 are shared across views: fold views
    into the batch dimension before calling).

    x:    [B, D]   float32
    w1_t: [D, H]   fc1 weight (transposed from PyTorch's [H, D])
    b1:   [1, H]   float32
    w2_t: [H, C]   fc2 weight (transposed)
    b2:   [1, C]   float32
    returns evidence: [B, C] float32
    """
    B, D = x.shape
    H = w1_t.shape[1]
    C = w2_t.shape[1]

    # Only the tiny weights are pre-cast for the MXU; X is cast in-kernel.
    if use_bf16:
        w1_t = w1_t.astype(jnp.bfloat16)
        w2_t = w2_t.astype(jnp.bfloat16)

    # Batch tile: multiple of 8 sublanes (16 when bf16 activations are used).
    # No wrapper padding: Pallas masks the partial boundary block itself.
    align = 16 if use_bf16 else 8
    tb = min(_round_up(B, align), _round_up(block_b, align))
    if num_cores >= 2:
        # Keep >= num_cores grid steps so the "parallel" batch axis can be
        # sharded across TensorCores (v7x); no-op on single-TC chips.
        tb = min(tb, max(_round_up(pl.cdiv(B, num_cores), align), align))
    grid_b = pl.cdiv(B, tb)

    # Honest cost estimate (no padded classes).
    flops = 2 * B * D * H + 2 * B * H * C
    bytes_accessed = int(
        B * D * x.dtype.itemsize
        + D * H * w1_t.dtype.itemsize + H * b1.dtype.itemsize
        + H * C * w2_t.dtype.itemsize + C * b2.dtype.itemsize
        + B * C * 4  # f32 evidence output
    )

    # Double-buffered X / output tiles + resident weights. Only raise the
    # scoped-VMEM limit if a very large block_b is requested (matters on
    # v5e's 16 MiB default scoped VMEM).
    w_item = 2 if use_bf16 else 4
    vmem_est = (2 * tb * D * x.dtype.itemsize + 2 * tb * C * 4
                + D * H * w_item + H * C * w_item + (H + C) * 4)
    compiler_kwargs = dict(dimension_semantics=("parallel",))
    if vmem_est > 12 * 1024 * 1024:
        compiler_kwargs["vmem_limit_bytes"] = min(2 * vmem_est, 60 * 1024 * 1024)

    return pl.pallas_call(
        _mlp_share_kernel,
        out_shape=jax.ShapeDtypeStruct((B, C), jnp.float32),
        grid_spec=pltpu.PrefetchScalarGridSpec(
            num_scalar_prefetch=0,
            grid=(grid_b,),
            in_specs=[
                pl.BlockSpec((tb, D), lambda i: (i, 0)),   # X tile, pipelined
                pl.BlockSpec((D, H), lambda i: (0, 0)),    # fc1 W, VMEM-resident
                pl.BlockSpec((1, H), lambda i: (0, 0)),    # fc1 b
                pl.BlockSpec((H, C), lambda i: (0, 0)),    # fc2 W (no lane pad)
                pl.BlockSpec((1, C), lambda i: (0, 0)),    # fc2 b
            ],
            out_specs=pl.BlockSpec((tb, C), lambda i: (i, 0)),  # un-padded (B, C)
        ),
        compiler_params=pltpu.CompilerParams(**compiler_kwargs),
        cost_estimate=pl.CostEstimate(
            flops=flops, transcendentals=0, bytes_accessed=bytes_accessed),
    )(x, w1_t, b1, w2_t, b2)


def _torch_linear_init(key, out_features, in_features):
    """Deterministic init matching PyTorch nn.Linear defaults
    (kaiming-uniform weights, uniform bias with bound 1/sqrt(fan_in))."""
    kw, kb = jax.random.split(key)
    bound = 1.0 / math.sqrt(in_features)
    w = jax.random.uniform(kw, (out_features, in_features),
                           minval=-bound, maxval=bound, dtype=jnp.float32)
    b = jax.random.uniform(kb, (out_features,),
                           minval=-bound, maxval=bound, dtype=jnp.float32)
    return w, b


if __name__ == "__main__":
    # Module config: num_views=2, dims=[[32]], num_classes=8
    #   -> fc1: Linear(32, 128), fc2: Linear(128, 8), shared across views.
    # TODO(synk): EvidenceCollector is built in __init__ but unused in forward
    # of BaseMLP_Share, so it is intentionally not implemented here.
    num_views = 2
    batch = 8
    in_dim = 32
    hidden = 128
    num_classes = 8

    key = jax.random.PRNGKey(0)
    kx, k1, k2 = jax.random.split(key, 3)

    # Per-view inputs; fc1/fc2 are shared, so fold views into the batch dim
    # and run ONE kernel for all views.
    x_views = jax.random.normal(kx, (num_views, batch, in_dim), dtype=jnp.float32)
    x = x_views.reshape(num_views * batch, in_dim)

    w1, b1 = _torch_linear_init(k1, hidden, in_dim)       # [128, 32], [128]
    w2, b2 = _torch_linear_init(k2, num_classes, hidden)  # [8, 128],  [8]

    # Glue (folded under jit): transpose to [in, out], 2D biases.
    w1_t = jnp.transpose(w1)                  # [32, 128]
    w2_t = jnp.transpose(w2)                  # [128, 8]
    b1_2d = b1.reshape(1, hidden)             # [1, 128]
    b2_2d = b2.reshape(1, num_classes)        # [1, 8]

    num_cores = _num_tensorcores()            # 2 on v7x, 1 on v5e/v6e

    # Plain-JAX reference (same math as the PyTorch forward).
    ref = jnp.maximum(x @ w1_t + b1_2d, 0.0) @ w2_t + b2_2d

    # 1) f32 path, small batch — exact check.
    evidence = jax.block_until_ready(
        base_mlp_share_forward(x, w1_t, b1_2d, w2_t, b2_2d, num_cores=num_cores))
    assert evidence.shape == (num_views * batch, num_classes)
    assert jnp.allclose(evidence, ref, atol=1e-5, rtol=1e-5)

    # 2) bf16-MXU path (X cast on-chip) — looser tolerance.
    evidence_bf16 = jax.block_until_ready(
        base_mlp_share_forward(x, w1_t, b1_2d, w2_t, b2_2d,
                               use_bf16=True, num_cores=num_cores))
    assert jnp.allclose(evidence_bf16, ref, atol=5e-2, rtol=5e-2)

    # 3) multi-tile grid with a non-divisible batch (exercises the pipelined
    #    X tiles, the partial boundary block with no wrapper pad/slice, and
    #    the parallel batch axis).
    big_batch = 100  # folded over 2 views -> 200 rows; block_b=64 -> 4 tiles
    xb = jax.random.normal(jax.random.PRNGKey(1),
                           (num_views * big_batch, in_dim), dtype=jnp.float32)
    refb = jnp.maximum(xb @ w1_t + b1_2d, 0.0) @ w2_t + b2_2d
    evb = jax.block_until_ready(
        base_mlp_share_forward(xb, w1_t, b1_2d, w2_t, b2_2d,
                               block_b=64, num_cores=num_cores))
    assert evb.shape == (num_views * big_batch, num_classes)
    assert jnp.allclose(evb, refb, atol=1e-5, rtol=1e-5)

    print("KERNEL_OK")
</pallas_src>

<mosaic_0001>
module attributes {stable_mosaic.version = 11 : i64} {
  func.func @_mlp_share_kernel(%arg0: i32, %arg1: memref<16x32xf32, #tpu.memory_space<vmem>>, %arg2: memref<32x128xf32, #tpu.memory_space<vmem>>, %arg3: memref<1x128xf32, #tpu.memory_space<vmem>>, %arg4: memref<128x8xf32, #tpu.memory_space<vmem>>, %arg5: memref<1x8xf32, #tpu.memory_space<vmem>>, %arg6: memref<16x8xf32, #tpu.memory_space<vmem>>) attributes {dimension_semantics = [#tpu.dimension_semantics<parallel>], iteration_bounds = array<i64: 1>, scalar_prefetch = 0 : i64, scratch_operands = 0 : i64, tpu.core_type = #tpu.core_type<tc>, window_params = [{transform_indices = @transform_0, window_bounds = array<i64: 16, 32>}, {pipeline_mode = #tpu.pipeline_mode<synchronous>, transform_indices = @transform_1, window_bounds = array<i64: 32, 128>}, {pipeline_mode = #tpu.pipeline_mode<synchronous>, transform_indices = @transform_2, window_bounds = array<i64: 1, 128>}, {pipeline_mode = #tpu.pipeline_mode<synchronous>, transform_indices = @transform_3, window_bounds = array<i64: 128, 8>}, {pipeline_mode = #tpu.pipeline_mode<synchronous>, transform_indices = @transform_4, window_bounds = array<i64: 1, 8>}, {transform_indices = @transform_5, window_bounds = array<i64: 16, 8>}]} {
    %c0 = arith.constant 0 : index
    %c0_0 = arith.constant 0 : index
    %0 = vector.load %arg1[%c0, %c0_0] : memref<16x32xf32, #tpu.memory_space<vmem>>, vector<16x32xf32>
    %c0_1 = arith.constant 0 : index
    %c0_2 = arith.constant 0 : index
    %1 = vector.load %arg2[%c0_1, %c0_2] : memref<32x128xf32, #tpu.memory_space<vmem>>, vector<32x128xf32>
    %cst = arith.constant dense<0.000000e+00> : vector<16x128xf32>
    %2 = tpu.matmul %0, %1, %cst {dimension_numbers = #tpu.dot_dimension_numbers<[1], [0], [0], [1], [0, 0, 1, 1], [], []>} : vector<16x32xf32>, vector<32x128xf32>, vector<16x128xf32> -> vector<16x128xf32>
    %c0_3 = arith.constant 0 : index
    %c0_4 = arith.constant 0 : index
    %3 = vector.load %arg3[%c0_3, %c0_4] : memref<1x128xf32, #tpu.memory_space<vmem>>, vector<1x128xf32>
    %4 = vector.broadcast %3 : vector<1x128xf32> to vector<16x128xf32>
    %5 = arith.addf %2, %4 : vector<16x128xf32>
    %cst_5 = arith.constant 0.000000e+00 : f32
    %6 = vector.broadcast %cst_5 : f32 to vector<16x128xf32>
    %7 = arith.maximumf %5, %6 : vector<16x128xf32>
    %c0_6 = arith.constant 0 : index
    %c0_7 = arith.constant 0 : index
    %8 = vector.load %arg4[%c0_6, %c0_7] : memref<128x8xf32, #tpu.memory_space<vmem>>, vector<128x8xf32>
    %cst_8 = arith.constant dense<0.000000e+00> : vector<16x8xf32>
    %9 = tpu.matmul %7, %8, %cst_8 {dimension_numbers = #tpu.dot_dimension_numbers<[1], [0], [0], [1], [0, 0, 1, 1], [], []>} : vector<16x128xf32>, vector<128x8xf32>, vector<16x8xf32> -> vector<16x8xf32>
    %c0_9 = arith.constant 0 : index
    %c0_10 = arith.constant 0 : index
    %10 = vector.load %arg5[%c0_9, %c0_10] : memref<1x8xf32, #tpu.memory_space<vmem>>, vector<1x8xf32>
    %11 = vector.broadcast %10 : vector<1x8xf32> to vector<16x8xf32>
    %12 = arith.addf %9, %11 : vector<16x8xf32>
    %c0_11 = arith.constant 0 : index
    %c0_12 = arith.constant 0 : index
    %13 = vector.load %arg6[%c0_11, %c0_12] : memref<16x8xf32, #tpu.memory_space<vmem>>, vector<16x8xf32>
    tpu.vector_store %arg6[%c0_11, %c0_12], %12 {strides = array<i32>} : memref<16x8xf32, #tpu.memory_space<vmem>>, vector<16x8xf32>,
    return
  }
  func.func @transform_0(%arg0: i32) -> (i32, i32) {
    %c0_i32 = arith.constant 0 : i32
    %c0_i32_0 = arith.constant 0 : i32
    return %arg0, %c0_i32 : i32, i32
  }
  func.func @transform_1(%arg0: i32) -> (i32, i32) {
    %c0_i32 = arith.constant 0 : i32
    %c0_i32_0 = arith.constant 0 : i32
    %c0_i32_1 = arith.constant 0 : i32
    return %c0_i32, %c0_i32_0 : i32, i32
  }
  func.func @transform_2(%arg0: i32) -> (i32, i32) {
    %c0_i32 = arith.constant 0 : i32
    %c0_i32_0 = arith.constant 0 : i32
    %c0_i32_1 = arith.constant 0 : i32
    return %c0_i32, %c0_i32_0 : i32, i32
  }
  func.func @transform_3(%arg0: i32) -> (i32, i32) {
    %c0_i32 = arith.constant 0 : i32
    %c0_i32_0 = arith.constant 0 : i32
    %c0_i32_1 = arith.constant 0 : i32
    return %c0_i32, %c0_i32_0 : i32, i32
  }
  func.func @transform_4(%arg0: i32) -> (i32, i32) {
    %c0_i32 = arith.constant 0 : i32
    %c0_i32_0 = arith.constant 0 : i32
    %c0_i32_1 = arith.constant 0 : i32
    return %c0_i32, %c0_i32_0 : i32, i32
  }
  func.func @transform_5(%arg0: i32) -> (i32, i32) {
    %c0_i32 = arith.constant 0 : i32
    %c0_i32_0 = arith.constant 0 : i32
    return %arg0, %c0_i32 : i32, i32
  }
}

</mosaic_0001>

<bundles_post_ra>
// kernel: base_mlp_share_forward.1
= control target key start
LH: loop header
LB: loop body
LE: loop exit
PB: predicated region body
PF: predicated region fallthrough
CT: control target
= control target key end

     0   :  { %vm33_vm0 = vcmask 261120   ;;  %vm215_vm1 = vcmask 64512   ;;  %s446_s1 = inlined_call_operand.vmem [shape: f32[32,128], index: 1, kind: input, shape index: {}]   ;;  %s447_s0 = inlined_call_operand.vmem [shape: f32[16,32], index: 0, kind: input, shape index: {}]   ;;  %s448_s3 = inlined_call_operand.vmem [shape: f32[128,8], index: 3, kind: input, shape index: {}]   ;;  %s449_s2 = inlined_call_operand.vmem [shape: f32[1,128], index: 2, kind: input, shape index: {}]   ;;  %s450_s4 = inlined_call_operand.vmem [shape: f32[1,8], index: 4, kind: input, shape index: {}]   ;;  %s451_s5 = inlined_call_operand.vmem [shape: f32[16,8], index: 5, kind: output, shape index: {}]  }
   0x1   :  { %v22_v0 = vld [vmem:[%s446_s1] sm:$0xff]  ;;  %v23_v1 = vld [vmem:[%s446_s1 + $0x8] sm:$0xff]  ;;  %v24_v2 = vld [vmem:[%s446_s1 + $0x10] sm:$0xff] }
   0x2   :  { %v296_v3 = vpack.c.bf16 %v23_v1, %v22_v0  ;;  %v25_v4 = vld [vmem:[%s446_s1 + $0x18] sm:$0xff]  ;;  %v20_v5 = vld [vmem:[%s447_s0] sm:$0xff]  ;;  %v118_v8 = vld [vmem:[%s448_s3 + $0x8] sm:$0xff] }
   0x3   :  { %v300_v6 = vpack.c.bf16 %v25_v4, %v24_v2  ;;  %258 = vmatprep.mubr.msk.f32.mxu0 %vm33_vm0, %v20_v5  ;;  %v117_v7 = vld [vmem:[%s448_s3] sm:$0xff]  ;;  %v119_v9 = vld [vmem:[%s448_s3 + $0x10] sm:$0xff]  ;;  %v120_v11 = vld [vmem:[%s448_s3 + $0x18] sm:$0xff] }
   0x4   :  { %297 = vmatprep.subr.bf16.mxu0 %v296_v3  ;;  %v304_v10 = vpack.c.bf16 %v118_v8, %v117_v7  ;;  %v308_v12 = vpack.c.bf16 %v120_v11, %v119_v9  ;;  %v121_v13 = vld [vmem:[%s448_s3 + $0x20] sm:$0xff]  ;;  %v122_v14 = vld [vmem:[%s448_s3 + $0x28] sm:$0xff]  ;;  %v123_v17 = vld [vmem:[%s448_s3 + $0x30] sm:$0xff] }
   0x5   :  { %299 = vmatpush3.bf16.msra.mxu0 %v296_v3  ;;  %v312_v15 = vpack.c.bf16 %v122_v14, %v121_v13  ;;  %v21_v16 = vld [vmem:[%s447_s0 + $0x8] sm:$0xff]  ;;  %v124_v18 = vld [vmem:[%s448_s3 + $0x38] sm:$0xff]  ;;  %v125_v20 = vld [vmem:[%s448_s3 + $0x40] sm:$0xff] }
   0x6   :  { %301 = vmatprep.subr.bf16.mxu0 %v300_v6  ;;  %305 = vmatprep.subr.bf16.mxu1 %v304_v10  ;;  %v316_v19 = vpack.c.bf16 %v124_v18, %v123_v17  ;;  %v126_v21 = vld [vmem:[%s448_s3 + $0x48] sm:$0xff]  ;;  %v127_v23 = vld [vmem:[%s448_s3 + $0x50] sm:$0xff]  ;;  %v128_v24 = vld [vmem:[%s448_s3 + $0x58] sm:$0xff] }
   0x7   :  { %307 = vmatpush3.bf16.msra.mxu1 %v304_v10  ;;  %v320_v22 = vpack.c.bf16 %v126_v21, %v125_v20  ;;  %v324_v25 = vpack.c.bf16 %v128_v24, %v127_v23  ;;  %v129_v26 = vld [vmem:[%s448_s3 + $0x60] sm:$0xff]  ;;  %v130_v27 = vld [vmem:[%s448_s3 + $0x68] sm:$0xff]  ;;  %v131_v29 = vld [vmem:[%s448_s3 + $0x70] sm:$0xff] }
   0x8   :  { %309 = vmatprep.subr.bf16.mxu1 %v308_v12  ;;  %v328_v28 = vpack.c.bf16 %v130_v27, %v129_v26  ;;  %v132_v30 = vld [vmem:[%s448_s3 + $0x78] sm:$0xff]  ;;  %v222_v32 = vld [vmem:[%s449_s2] ss:$0 sm:$0xff] }
   0x9   :  { %303 = vmatpush3.bf16.msra.mxu0 %v300_v6  ;;  %v332_v31 = vpack.c.bf16 %v132_v30, %v131_v29  ;;  %v225_v39 = vld [vmem:[%s450_s4] ss:$0 sm:$0xff] }
   0xb   :  { %311 = vmatpush3.bf16.msra.mxu1 %v308_v12 }
   0xc   :  { %259 = vmatmul.mubr.msk.f32.vlgmr.msra.gmra.mrb[0].mxu0 %vm33_vm0, %v21_v16  ;;  %313 = vmatprep.subr.bf16.mxu1 %v312_v15 }
   0xf   :  { %315 = vmatpush3.bf16.msra.mxu1 %v312_v15 }
  0x10   :  { %317 = vmatprep.subr.bf16.mxu1 %v316_v19 }
  0x13   :  { %319 = vmatpush3.bf16.msra.mxu1 %v316_v19 }
  0x14   :  { %321 = vmatprep.subr.bf16.mxu1 %v320_v22 }
  0x17   :  { %323 = vmatpush3.bf16.msra.mxu1 %v320_v22 }
  0x18   :  { %325 = vmatprep.subr.bf16.mxu1 %v324_v25 }
  0x1b   :  { %327 = vmatpush3.bf16.msra.mxu1 %v324_v25 }
  0x1c   :  { %329 = vmatprep.subr.bf16.mxu1 %v328_v28 }
  0x1f   :  { %331 = vmatpush3.bf16.msra.mxu1 %v328_v28 }
  0x20   :  { %333 = vmatprep.subr.bf16.mxu1 %v332_v31 }
  0x23   :  { %335 = vmatpush3.bf16.msra.mxu1 %v332_v31 }
  0xdf   :  { %v260_v33 = vpop.f32.mrb[0].mxu0 }
  0xe0   :  { %v112_v34 = vadd.f32 %v260_v33, %v222_v32  ;;  %v106_v35 = vpop.f32.mrb[1].mxu0 }
  0xe1   :  { %v107_v36 = vadd.f32 %v222_v32, %v106_v35 }
  0xe2   :  { %v116_v38 = vmax.f32 %v112_v34, 0.0 }
  0xe3   :  { %v115_v37 = vmax.f32 %v107_v36, 0.0 }
  0xe5   :  { %293 = vmatprep.mubr.f32.mxu1 %v115_v37 }
  0xe6   :  { %294 = vmatmul.mubr.f32.vlgmr.msra.gmra.mrb[0].mxu1 %v116_v38 }
 0x1b9   :  { %v295_v40 = vpop.f32.mrb[0].mxu1 }
 0x1ba   :  { %v212_v41 = vadd.f32 %v295_v40, %v225_v39  ;;  %v206_v42 = vpop.f32.mrb[1].mxu1 }
 0x1bb   :  { %v207_v43 = vadd.f32 %v225_v39, %v206_v42 }
 0x1bc   :  { %217 = vst.msk [vmem:[%s451_s5 + $0x8] sm:$0xff] %vm215_vm1, %v212_v41 }
 0x1bd   :  { %216 = vst.msk [vmem:[%s451_s5] sm:$0xff] %vm215_vm1, %v207_v43 }

</bundles_post_ra>
